<compile_context>
chip_gen: v6e
topology: v6e:2x2x1
jax: 0.10.0
libtpu: 0.0.40
codegen_flags: <defaults>
</compile_context>

<pallas_src>
import functools

import jax
import jax.numpy as jnp
from jax import lax
from jax.experimental import pallas as pl
from jax.experimental.pallas import tpu as pltpu


def _round_up(x, m):
    return ((x + m - 1) // m) * m


def _num_parallel_blocks():
    # v7x has 2 TensorCores per chip -> split the lane axis into 2 parallel
    # grid steps (one per TC). Single-TC v5e/v6e: one big block (minimum
    # per-step overhead).
    try:
        kind = jax.devices()[0].device_kind.lower()
    except Exception:
        return 1
    return 2 if ("v7" in kind or "7x" in kind) else 1


# ------------------------- Pallas kernel (hot path) -------------------------
def _conv_taps_kernel(x_ref, w_ref, o_ref, *, wp, halo):
    # x_ref: (Cpad, Lin)  spatially padded input, flattened image-major as
    #        column index n*Hp*Wp + r*Wp + s; row C is all-ones (bias channel),
    #        remaining padded rows are zero.
    # w_ref: (9, Cout, Cpad) per-tap weight slices; bias folded into the
    #        center tap's ones-channel column.
    # o_ref: (Cout, TL)   lane-dense output tile (TL is a multiple of 128).
    cout, tl = o_ref.shape
    col0 = pl.multiple_of(pl.program_id(0) * tl, 128)
    # One aligned dynamic window load; the 9 taps are static lane shifts of it.
    xwin = x_ref[:, pl.ds(col0, tl + halo)]
    acc = jnp.zeros((cout, tl), jnp.float32)
    for di in range(3):
        for dj in range(3):
            off = di * wp + dj                       # static flat-column shift
            acc = acc + jnp.dot(w_ref[di * 3 + dj], xwin[:, off:off + tl],
                                preferred_element_type=jnp.float32)
    o_ref[...] = jnp.maximum(acc, 0.0).astype(o_ref.dtype)


def conv3x3_relu_pallas(x_nchw, weight, bias):
    """Conv2d(stride=1, padding=1) + ReLU, fused im2col-by-shifts in Pallas.

    x_nchw: [N, C, H, W]   weight: [Cout, Cin, 3, 3]   bias: [Cout]
    returns [N, Cout, H, W]
    """
    N, C, H, W = x_nchw.shape
    Cout, Cin, kh, kw = weight.shape
    assert (Cin, kh, kw) == (C, 3, 3)

    Hp, Wp = H + 2, W + 2
    Lp = Hp * Wp
    L = N * Lp                                   # flattened padded spatial size

    nb = _num_parallel_blocks()
    Lout = _round_up(L, 128 * nb)                # lane-dense, splits evenly
    TL = Lout // nb
    halo = _round_up(2 * Wp + 2, 128)            # covers the max tap offset
    Lin = Lout + halo
    Cpad = _round_up(C + 1, 8)                   # real channels + ones channel

    # ---- light layout prep (1x data; no 9x im2col slab) ----
    xp = jnp.pad(x_nchw, ((0, 0), (0, 0), (1, 1), (1, 1)))      # (N, C, Hp, Wp)
    xflat = xp.transpose(1, 0, 2, 3).reshape(C, L)              # (C, L)
    xflat = jnp.concatenate(
        [jnp.pad(xflat, ((0, 0), (0, Lin - L))),
         jnp.ones((1, Lin), x_nchw.dtype),                      # bias channel
         jnp.zeros((Cpad - C - 1, Lin), x_nchw.dtype)],
        axis=0)                                                 # (Cpad, Lin)

    w9 = weight.transpose(2, 3, 0, 1).reshape(kh * kw, Cout, C)  # (9, Cout, C)
    w9 = jnp.pad(w9, ((0, 0), (0, 0), (0, Cpad - C)))            # (9, Cout, Cpad)
    center = (kh // 2) * kw + (kw // 2)
    w9 = w9.at[center, :, C].set(bias.astype(w9.dtype))          # fold bias

    kernel = functools.partial(_conv_taps_kernel, wp=Wp, halo=halo)
    out2d = pl.pallas_call(
        kernel,
        out_shape=jax.ShapeDtypeStruct((Cout, Lout), x_nchw.dtype),
        grid_spec=pltpu.PrefetchScalarGridSpec(
            num_scalar_prefetch=0,
            grid=(nb,),
            in_specs=[
                pl.BlockSpec((Cpad, Lin), lambda t: (0, 0)),        # full input
                pl.BlockSpec((kh * kw, Cout, Cpad),
                             lambda t: (0, 0, 0)),                  # weights
            ],
            out_specs=pl.BlockSpec((Cout, TL), lambda t: (0, t)),
        ),
        compiler_params=pltpu.CompilerParams(
            dimension_semantics=("parallel",)),
    )(xflat, w9)

    # Drop padded-border / junk columns and go back to NCHW (cheap leading
    # transpose; last two dims untouched).
    out = out2d[:, :L].reshape(Cout, N, Hp, Wp)[:, :, :H, :W]
    return out.transpose(1, 0, 2, 3)


# --------------------------- DistModule equivalent ---------------------------
class InnerConvRelu:
    """The concrete module wrapped by DistModule (Conv2d 4->8, k=3, p=1, ReLU)."""

    def __init__(self, key, cin=4, cout=8):
        kw_, kb_ = jax.random.split(key)
        self.weight = (jax.random.normal(kw_, (cout, cin, 3, 3), jnp.float32)
                       * 0.1)
        self.bias = jax.random.normal(kb_, (cout,), jnp.float32) * 0.1

    def __call__(self, x):
        return conv3x3_relu_pallas(x, self.weight, self.bias)


class DistModule:
    """JAX analogue of dist_utils.DistModule: broadcast params, forward = inner."""

    def __init__(self, module):
        self.module = module
        self._broadcast_params()

    def _broadcast_params(self):
        # torch.distributed.broadcast(p, 0): identity on a single device.
        # TODO(synk): multi-host param broadcast would use jax shard/pmap
        # collectives; not needed for a single-device synthetic kernel.
        pass

    def __call__(self, *inputs, **kwargs):
        return self.module(*inputs, **kwargs)

    def train(self, mode=True):
        # Inner module has no train/eval-dependent behavior.
        return self


# ----------------------------------- main ------------------------------------
if __name__ == "__main__":
    key = jax.random.PRNGKey(0)
    k_x, k_m = jax.random.split(key)

    x = jax.random.normal(k_x, (2, 4, 16, 16), jnp.float32)   # NCHW

    model = DistModule(InnerConvRelu(k_m))
    out = jax.block_until_ready(model(x))

    # Reference check against XLA conv (same semantics as torch Conv2d NCHW).
    ref = lax.conv_general_dilated(
        x, model.module.weight, window_strides=(1, 1), padding="SAME",
        dimension_numbers=("NCHW", "OIHW", "NCHW"),
    ) + model.module.bias.reshape(1, -1, 1, 1)
    ref = jnp.maximum(ref, 0.0)

    assert out.shape == (2, 8, 16, 16)
    assert jnp.allclose(out, ref, atol=2e-4, rtol=2e-4), float(
        jnp.max(jnp.abs(out - ref)))

    print("KERNEL_OK")
</pallas_src>

<mosaic_0001>
module attributes {stable_mosaic.version = 11 : i64} {
  func.func @_conv_taps_kernel(%arg0: i32, %arg1: memref<8x896xf32, #tpu.memory_space<vmem>>, %arg2: memref<9x8x8xf32, #tpu.memory_space<vmem>>, %arg3: memref<8x768xf32, #tpu.memory_space<vmem>>) attributes {dimension_semantics = [#tpu.dimension_semantics<parallel>], iteration_bounds = array<i64: 1>, scalar_prefetch = 0 : i64, scratch_operands = 0 : i64, tpu.core_type = #tpu.core_type<tc>, window_params = [{pipeline_mode = #tpu.pipeline_mode<synchronous>, transform_indices = @transform_0, window_bounds = array<i64: 8, 896>}, {pipeline_mode = #tpu.pipeline_mode<synchronous>, transform_indices = @transform_1, window_bounds = array<i64: 9, 8, 8>}, {transform_indices = @transform_2, window_bounds = array<i64: 8, 768>}]} {
    %c768_i32 = arith.constant 768 : i32
    %0 = arith.muli %arg0, %c768_i32 : i32
    %1 = tpu.assume_multiple %0, 128 : i32
    %c0 = arith.constant 0 : index
    %2 = arith.index_cast %1 : i32 to index
    %3 = vector.load %arg1[%c0, %2] : memref<8x896xf32, #tpu.memory_space<vmem>>, vector<8x896xf32>
    %cst = arith.constant 0.000000e+00 : f32
    %4 = vector.broadcast %cst : f32 to vector<8x768xf32>
    %c0_0 = arith.constant 0 : index
    %c0_1 = arith.constant 0 : index
    %c0_2 = arith.constant 0 : index
    %5 = vector.load %arg2[%c0_0, %c0_1, %c0_2] : memref<9x8x8xf32, #tpu.memory_space<vmem>>, vector<1x8x8xf32>
    %6 = vector.shape_cast %5 : vector<1x8x8xf32> to vector<8x8xf32>
    %7 = vector.extract_strided_slice %3 {offsets = [0, 0], sizes = [8, 768], strides = [1, 1]} : vector<8x896xf32> to vector<8x768xf32>
    %cst_3 = arith.constant dense<0.000000e+00> : vector<8x768xf32>
    %8 = tpu.matmul %6, %7, %cst_3 {dimension_numbers = #tpu.dot_dimension_numbers<[1], [0], [0], [1], [0, 0, 1, 1], [], []>} : vector<8x8xf32>, vector<8x768xf32>, vector<8x768xf32> -> vector<8x768xf32>
    %9 = arith.addf %4, %8 : vector<8x768xf32>
    %c1 = arith.constant 1 : index
    %c0_4 = arith.constant 0 : index
    %c0_5 = arith.constant 0 : index
    %10 = vector.load %arg2[%c1, %c0_4, %c0_5] : memref<9x8x8xf32, #tpu.memory_space<vmem>>, vector<1x8x8xf32>
    %11 = vector.shape_cast %10 : vector<1x8x8xf32> to vector<8x8xf32>
    %12 = vector.extract_strided_slice %3 {offsets = [0, 1], sizes = [8, 768], strides = [1, 1]} : vector<8x896xf32> to vector<8x768xf32>
    %cst_6 = arith.constant dense<0.000000e+00> : vector<8x768xf32>
    %13 = tpu.matmul %11, %12, %cst_6 {dimension_numbers = #tpu.dot_dimension_numbers<[1], [0], [0], [1], [0, 0, 1, 1], [], []>} : vector<8x8xf32>, vector<8x768xf32>, vector<8x768xf32> -> vector<8x768xf32>
    %14 = arith.addf %9, %13 : vector<8x768xf32>
    %c2 = arith.constant 2 : index
    %c0_7 = arith.constant 0 : index
    %c0_8 = arith.constant 0 : index
    %15 = vector.load %arg2[%c2, %c0_7, %c0_8] : memref<9x8x8xf32, #tpu.memory_space<vmem>>, vector<1x8x8xf32>
    %16 = vector.shape_cast %15 : vector<1x8x8xf32> to vector<8x8xf32>
    %17 = vector.extract_strided_slice %3 {offsets = [0, 2], sizes = [8, 768], strides = [1, 1]} : vector<8x896xf32> to vector<8x768xf32>
    %cst_9 = arith.constant dense<0.000000e+00> : vector<8x768xf32>
    %18 = tpu.matmul %16, %17, %cst_9 {dimension_numbers = #tpu.dot_dimension_numbers<[1], [0], [0], [1], [0, 0, 1, 1], [], []>} : vector<8x8xf32>, vector<8x768xf32>, vector<8x768xf32> -> vector<8x768xf32>
    %19 = arith.addf %14, %18 : vector<8x768xf32>
    %c3 = arith.constant 3 : index
    %c0_10 = arith.constant 0 : index
    %c0_11 = arith.constant 0 : index
    %20 = vector.load %arg2[%c3, %c0_10, %c0_11] : memref<9x8x8xf32, #tpu.memory_space<vmem>>, vector<1x8x8xf32>
    %21 = vector.shape_cast %20 : vector<1x8x8xf32> to vector<8x8xf32>
    %22 = vector.extract_strided_slice %3 {offsets = [0, 18], sizes = [8, 768], strides = [1, 1]} : vector<8x896xf32> to vector<8x768xf32>
    %cst_12 = arith.constant dense<0.000000e+00> : vector<8x768xf32>
    %23 = tpu.matmul %21, %22, %cst_12 {dimension_numbers = #tpu.dot_dimension_numbers<[1], [0], [0], [1], [0, 0, 1, 1], [], []>} : vector<8x8xf32>, vector<8x768xf32>, vector<8x768xf32> -> vector<8x768xf32>
    %24 = arith.addf %19, %23 : vector<8x768xf32>
    %c4 = arith.constant 4 : index
    %c0_13 = arith.constant 0 : index
    %c0_14 = arith.constant 0 : index
    %25 = vector.load %arg2[%c4, %c0_13, %c0_14] : memref<9x8x8xf32, #tpu.memory_space<vmem>>, vector<1x8x8xf32>
    %26 = vector.shape_cast %25 : vector<1x8x8xf32> to vector<8x8xf32>
    %27 = vector.extract_strided_slice %3 {offsets = [0, 19], sizes = [8, 768], strides = [1, 1]} : vector<8x896xf32> to vector<8x768xf32>
    %cst_15 = arith.constant dense<0.000000e+00> : vector<8x768xf32>
    %28 = tpu.matmul %26, %27, %cst_15 {dimension_numbers = #tpu.dot_dimension_numbers<[1], [0], [0], [1], [0, 0, 1, 1], [], []>} : vector<8x8xf32>, vector<8x768xf32>, vector<8x768xf32> -> vector<8x768xf32>
    %29 = arith.addf %24, %28 : vector<8x768xf32>
    %c5 = arith.constant 5 : index
    %c0_16 = arith.constant 0 : index
    %c0_17 = arith.constant 0 : index
    %30 = vector.load %arg2[%c5, %c0_16, %c0_17] : memref<9x8x8xf32, #tpu.memory_space<vmem>>, vector<1x8x8xf32>
    %31 = vector.shape_cast %30 : vector<1x8x8xf32> to vector<8x8xf32>
    %32 = vector.extract_strided_slice %3 {offsets = [0, 20], sizes = [8, 768], strides = [1, 1]} : vector<8x896xf32> to vector<8x768xf32>
    %cst_18 = arith.constant dense<0.000000e+00> : vector<8x768xf32>
    %33 = tpu.matmul %31, %32, %cst_18 {dimension_numbers = #tpu.dot_dimension_numbers<[1], [0], [0], [1], [0, 0, 1, 1], [], []>} : vector<8x8xf32>, vector<8x768xf32>, vector<8x768xf32> -> vector<8x768xf32>
    %34 = arith.addf %29, %33 : vector<8x768xf32>
    %c6 = arith.constant 6 : index
    %c0_19 = arith.constant 0 : index
    %c0_20 = arith.constant 0 : index
    %35 = vector.load %arg2[%c6, %c0_19, %c0_20] : memref<9x8x8xf32, #tpu.memory_space<vmem>>, vector<1x8x8xf32>
    %36 = vector.shape_cast %35 : vector<1x8x8xf32> to vector<8x8xf32>
    %37 = vector.extract_strided_slice %3 {offsets = [0, 36], sizes = [8, 768], strides = [1, 1]} : vector<8x896xf32> to vector<8x768xf32>
    %cst_21 = arith.constant dense<0.000000e+00> : vector<8x768xf32>
    %38 = tpu.matmul %36, %37, %cst_21 {dimension_numbers = #tpu.dot_dimension_numbers<[1], [0], [0], [1], [0, 0, 1, 1], [], []>} : vector<8x8xf32>, vector<8x768xf32>, vector<8x768xf32> -> vector<8x768xf32>
    %39 = arith.addf %34, %38 : vector<8x768xf32>
    %c7 = arith.constant 7 : index
    %c0_22 = arith.constant 0 : index
    %c0_23 = arith.constant 0 : index
    %40 = vector.load %arg2[%c7, %c0_22, %c0_23] : memref<9x8x8xf32, #tpu.memory_space<vmem>>, vector<1x8x8xf32>
    %41 = vector.shape_cast %40 : vector<1x8x8xf32> to vector<8x8xf32>
    %42 = vector.extract_strided_slice %3 {offsets = [0, 37], sizes = [8, 768], strides = [1, 1]} : vector<8x896xf32> to vector<8x768xf32>
    %cst_24 = arith.constant dense<0.000000e+00> : vector<8x768xf32>
    %43 = tpu.matmul %41, %42, %cst_24 {dimension_numbers = #tpu.dot_dimension_numbers<[1], [0], [0], [1], [0, 0, 1, 1], [], []>} : vector<8x8xf32>, vector<8x768xf32>, vector<8x768xf32> -> vector<8x768xf32>
    %44 = arith.addf %39, %43 : vector<8x768xf32>
    %c8 = arith.constant 8 : index
    %c0_25 = arith.constant 0 : index
    %c0_26 = arith.constant 0 : index
    %45 = vector.load %arg2[%c8, %c0_25, %c0_26] : memref<9x8x8xf32, #tpu.memory_space<vmem>>, vector<1x8x8xf32>
    %46 = vector.shape_cast %45 : vector<1x8x8xf32> to vector<8x8xf32>
    %47 = vector.extract_strided_slice %3 {offsets = [0, 38], sizes = [8, 768], strides = [1, 1]} : vector<8x896xf32> to vector<8x768xf32>
    %cst_27 = arith.constant dense<0.000000e+00> : vector<8x768xf32>
    %48 = tpu.matmul %46, %47, %cst_27 {dimension_numbers = #tpu.dot_dimension_numbers<[1], [0], [0], [1], [0, 0, 1, 1], [], []>} : vector<8x8xf32>, vector<8x768xf32>, vector<8x768xf32> -> vector<8x768xf32>
    %49 = arith.addf %44, %48 : vector<8x768xf32>
    %cst_28 = arith.constant 0.000000e+00 : f32
    %50 = vector.broadcast %cst_28 : f32 to vector<8x768xf32>
    %51 = arith.maximumf %49, %50 : vector<8x768xf32>
    %c0_29 = arith.constant 0 : index
    %c0_30 = arith.constant 0 : index
    %52 = vector.load %arg3[%c0_29, %c0_30] : memref<8x768xf32, #tpu.memory_space<vmem>>, vector<8x768xf32>
    tpu.vector_store %arg3[%c0_29, %c0_30], %51 {strides = array<i32>} : memref<8x768xf32, #tpu.memory_space<vmem>>, vector<8x768xf32>,
    return
  }
  func.func @transform_0(%arg0: i32) -> (i32, i32) {
    %c0_i32 = arith.constant 0 : i32
    %c0_i32_0 = arith.constant 0 : i32
    %c0_i32_1 = arith.constant 0 : i32
    return %c0_i32, %c0_i32_0 : i32, i32
  }
  func.func @transform_1(%arg0: i32) -> (i32, i32, i32) {
    %c0_i32 = arith.constant 0 : i32
    %c0_i32_0 = arith.constant 0 : i32
    %c0_i32_1 = arith.constant 0 : i32
    %c0_i32_2 = arith.constant 0 : i32
    return %c0_i32, %c0_i32_0, %c0_i32_1 : i32, i32, i32
  }
  func.func @transform_2(%arg0: i32) -> (i32, i32) {
    %c0_i32 = arith.constant 0 : i32
    %c0_i32_0 = arith.constant 0 : i32
    return %c0_i32, %arg0 : i32, i32
  }
}

</mosaic_0001>

<bundles_post_ra>
// kernel: tpu_custom_call.1
= control target key start
LH: loop header
LB: loop body
LE: loop exit
PB: predicated region body
PF: predicated region fallthrough
CT: control target
= control target key end

     0   :  { %s2346_s13 = smov 127   ;;  %v2347_v4 = vmov 0.0   ;;  %s2590_s0 = inlined_call_operand.vmem [shape: f32[8,896], index: 0, kind: input, shape index: {}]   ;;  %s2591_s1 = inlined_call_operand.vmem [shape: f32[9,8,8], index: 1, kind: input, shape index: {}]   ;;  %s2592_s2 = inlined_call_operand.hbm [shape: f32[8,768], index: 2, kind: output, shape index: {}]  }
   0x1   :  { %v2374_v0 = vld [vmem:[%s2590_s0 + $0x8] sm:$0xff]  ;;  %v2379_v1 = vld [vmem:[%s2590_s0] sm:$0xff]  ;;  %v2386_v2 = vld [vmem:[%s2590_s0 + $0x10] sm:$0xff]  ;;  %129 = vmatprep.mubr.f32.mxu0 %v2347_v4  ;;  %200 = vmatprep.mubr.f32.mxu1 %v2347_v4 }
   0x2   :  { %36 = vrot.lane.b32.xlu0 %v2374_v0, %s2346_s13  ;;  %34 = vrot.lane.b32.xlu1 %v2379_v1, %s2346_s13  ;;  %v2391_v3 = vld [vmem:[%s2590_s0 + $0x18] sm:$0xff] }
   0x3   :  { %7 = vsyncpa [#allocation3], 0  ;;  %v2400_v5 = vld [vmem:[%s2590_s0 + $0x20] sm:$0xff]  ;;  %v2405_v6 = vld [vmem:[%s2590_s0 + $0x28] sm:$0xff]  ;;  %s2348_s24 = smov 126   ;;  %s2349_s25 = smov 110  }
   0x4   :  { %v23_v7 = vld [vmem:[%s2590_s0 + $0x30] sm:$0xff]  ;;  %s2350_s0 = smov 109   ;;  %s2351_s26 = smov 108   ;;  %vm48_vm0 = vcmask 1039360   ;;  %v2279_v13 = vld [vmem:[%s2591_s1 + $0x8] sm:$0xff]  ;;  %vm61_vm1 = vcmask 64512  }
   0x5   :  { %s2352_s27 = smov 92   ;;  %s2353_s28 = smov 91   ;;  %vm510_vm2 = vcmask 1031168   ;;  %v24_v23 = vld [vmem:[%s2591_s1] sm:$0xff]  ;;  %v2286_v32 = vld [vmem:[%s2591_s1 + $0x10] sm:$0xff]  ;;  %vm761_vm3 = vcmask 900096  }
   0x6   :  { %38 = vrot.lane.b32.xlu0 %v2386_v2, %s2346_s13  ;;  %40 = vrot.lane.b32.xlu1 %v2391_v3, %s2346_s13  ;;  %s2354_s29 = smov 90   ;;  %v2290_v44 = vld [vmem:[%s2591_s1 + $0x18] sm:$0xff]  ;;  %vm1012_vm4 = vcmask 891904   ;;  %v2294_v56 = vld [vmem:[%s2591_s1 + $0x20] sm:$0xff]  ;;  %vm1263_vm5 = vcmask 883712   ;;  %vm1514_vm6 = vcmask 752640  }
   0x7   :  { %vm1765_vm7 = vcmask 744448   ;;  %vm2016_vm8 = vcmask 736256  }
   0xa   :  { %42 = vrot.lane.b32.xlu0 %v2400_v5, %s2346_s13  ;;  %44 = vrot.lane.b32.xlu1 %v2405_v6, %s2346_s13 }
   0xe   :  { %46 = vrot.lane.b32.xlu0 %v23_v7, %s2346_s13  ;;  %498 = vrot.lane.b32.xlu1 %v2374_v0, %s2348_s24 }
  0x12   :  { %500 = vrot.lane.b32.xlu0 %v2386_v2, %s2348_s24  ;;  %496 = vrot.lane.b32.xlu1 %v2379_v1, %s2348_s24 }
  0x16   :  { %502 = vrot.lane.b32.xlu0 %v2391_v3, %s2348_s24  ;;  %504 = vrot.lane.b32.xlu1 %v2400_v5, %s2348_s24 }
  0x1a   :  { %506 = vrot.lane.b32.xlu0 %v2405_v6, %s2348_s24  ;;  %508 = vrot.lane.b32.xlu1 %v23_v7, %s2348_s24 }
  0x1e   :  { %749 = vrot.lane.b32.xlu0 %v2374_v0, %s2349_s25  ;;  %751 = vrot.lane.b32.xlu1 %v2386_v2, %s2349_s25 }
  0x22   :  { %753 = vrot.lane.b32.xlu0 %v2391_v3, %s2349_s25  ;;  %755 = vrot.lane.b32.xlu1 %v2400_v5, %s2349_s25 }
  0x26   :  { %747 = vrot.lane.b32.xlu0 %v2379_v1, %s2349_s25  ;;  %757 = vrot.lane.b32.xlu1 %v2405_v6, %s2349_s25 }
  0x2a   :  { %759 = vrot.lane.b32.xlu0 %v23_v7, %s2349_s25  ;;  %1000 = vrot.lane.b32.xlu1 %v2374_v0, %s2350_s0 }
  0x2e   :  { %1002 = vrot.lane.b32.xlu0 %v2386_v2, %s2350_s0  ;;  %998 = vrot.lane.b32.xlu1 %v2379_v1, %s2350_s0 }
  0x32   :  { %1004 = vrot.lane.b32.xlu0 %v2391_v3, %s2350_s0  ;;  %1006 = vrot.lane.b32.xlu1 %v2400_v5, %s2350_s0 }
  0x36   :  { %1008 = vrot.lane.b32.xlu0 %v2405_v6, %s2350_s0  ;;  %1010 = vrot.lane.b32.xlu1 %v23_v7, %s2350_s0 }
  0x3a   :  { %1251 = vrot.lane.b32.xlu0 %v2374_v0, %s2351_s26  ;;  %1253 = vrot.lane.b32.xlu1 %v2386_v2, %s2351_s26 }
  0x3e   :  { %1255 = vrot.lane.b32.xlu0 %v2391_v3, %s2351_s26  ;;  %1257 = vrot.lane.b32.xlu1 %v2400_v5, %s2351_s26 }
  0x42   :  { %1249 = vrot.lane.b32.xlu0 %v2379_v1, %s2351_s26  ;;  %1259 = vrot.lane.b32.xlu1 %v2405_v6, %s2351_s26 }
  0x46   :  { %1261 = vrot.lane.b32.xlu0 %v23_v7, %s2351_s26  ;;  %1502 = vrot.lane.b32.xlu1 %v2374_v0, %s2352_s27 }
  0x4a   :  { %1504 = vrot.lane.b32.xlu0 %v2386_v2, %s2352_s27  ;;  %1500 = vrot.lane.b32.xlu1 %v2379_v1, %s2352_s27 }
  0x4e   :  { %1506 = vrot.lane.b32.xlu0 %v2391_v3, %s2352_s27  ;;  %1508 = vrot.lane.b32.xlu1 %v2400_v5, %s2352_s27 }
  0x52   :  { %1510 = vrot.lane.b32.xlu0 %v2405_v6, %s2352_s27  ;;  %1512 = vrot.lane.b32.xlu1 %v23_v7, %s2352_s27 }
  0x56   :  { %1753 = vrot.lane.b32.xlu0 %v2374_v0, %s2353_s28  ;;  %1755 = vrot.lane.b32.xlu1 %v2386_v2, %s2353_s28 }
  0x5a   :  { %1757 = vrot.lane.b32.xlu0 %v2391_v3, %s2353_s28  ;;  %1759 = vrot.lane.b32.xlu1 %v2400_v5, %s2353_s28 }
  0x5e   :  { %1751 = vrot.lane.b32.xlu0 %v2379_v1, %s2353_s28  ;;  %1761 = vrot.lane.b32.xlu1 %v2405_v6, %s2353_s28 }
  0x62   :  { %1763 = vrot.lane.b32.xlu0 %v23_v7, %s2353_s28  ;;  %2004 = vrot.lane.b32.xlu1 %v2374_v0, %s2354_s29 }
  0x66   :  { %2006 = vrot.lane.b32.xlu0 %v2386_v2, %s2354_s29  ;;  %2002 = vrot.lane.b32.xlu1 %v2379_v1, %s2354_s29 }
  0x6a   :  { %2008 = vrot.lane.b32.xlu0 %v2391_v3, %s2354_s29  ;;  %2010 = vrot.lane.b32.xlu1 %v2400_v5, %s2354_s29 }
  0x6e   :  { %2012 = vrot.lane.b32.xlu0 %v2405_v6, %s2354_s29  ;;  %2014 = vrot.lane.b32.xlu1 %v23_v7, %s2354_s29 }
  0x74   :  { %v37_v8 = vpop.permute.xlu0 %36  ;;  %v35_v9 = vpop.permute.xlu1 %34 }
  0x75   :  { %v49_v14 = vsel %vm48_vm0, %v35_v9, %v37_v8  ;;  %v2298_v9 = vld [vmem:[%s2591_s1 + $0x28] sm:$0xff] }
  0x78   :  { %v39_v10 = vpop.permute.xlu0 %38  ;;  %v41_v11 = vpop.permute.xlu1 %40 }
  0x79   :  { %v50_v12 = vsel %vm48_vm0, %v37_v8, %v39_v10  ;;  %v51_v18 = vsel %vm48_vm0, %v39_v10, %v41_v11 }
  0x7a   :  { %95 = vmatprep.subr.mxu0 %v50_v12 }
  0x7b   :  { %96 = vmatpush1.msra.mxu0 %v49_v14 }
  0x7c   :  { %v43_v15 = vpop.permute.xlu0 %42  ;;  %v45_v16 = vpop.permute.xlu1 %44  ;;  %2280 = vmatmul.mubr.msk.f32.vlgmr.msra.gmra.mxu0 %vm61_vm1, %v2279_v13 }
  0x7d   :  { %v52_v17 = vsel %vm48_vm0, %v41_v11, %v43_v15  ;;  %271 = vmatprep.mubr.f32.mxu0 %v2347_v4  ;;  %v53_v22 = vsel %vm48_vm0, %v43_v15, %v45_v16 }
  0x7e   :  { %166 = vmatprep.subr.mxu1 %v52_v17 }
  0x7f   :  { %167 = vmatpush1.msra.mxu1 %v51_v18 }
  0x80   :  { %v47_v19 = vpop.permute.xlu0 %46  ;;  %v499_v20 = vpop.permute.xlu1 %498  ;;  %2281 = vmatmul.mubr.msk.f32.vlgmr.msra.gmra.mxu1 %vm61_vm1, %v2279_v13  ;;  %311 = vmatprep.subr.mxu1 %v2374_v0 }
  0x81   :  { %v54_v21 = vsel %vm48_vm0, %v45_v16, %v47_v19  ;;  %312 = vmatpush1.msra.mxu1 %v2379_v1  ;;  %345 = vmatprep.mubr.f32.mxu1 %v2347_v4 }
  0x82   :  { %237 = vmatprep.subr.mxu0 %v54_v21  ;;  %453 = vmatprep.subr.mxu1 %v2405_v6  ;;  %v2302_v21 = vld [vmem:[%s2591_s1 + $0x30] sm:$0xff] }
  0x83   :  { %238 = vmatpush1.msra.mxu0 %v53_v22 }
  0x84   :  { %v501_v24 = vpop.permute.xlu0 %500  ;;  %2282 = vmatmul.mubr.msk.f32.vlgmr.msra.gmra.mxu0 %vm61_vm1, %v2279_v13  ;;  %382 = vmatprep.subr.mxu0 %v2391_v3  ;;  %v497_v25 = vpop.permute.xlu1 %496 }
  0x85   :  { %383 = vmatpush1.msra.mxu0 %v2386_v2  ;;  %v512_v26 = vsel %vm510_vm2, %v499_v20, %v501_v24  ;;  %2283 = vmatmul.mubr.msk.f32.vlgmr.msra.gmra.mxu1 %vm61_vm1, %v24_v23  ;;  %v511_v27 = vsel %vm510_vm2, %v497_v25, %v499_v20 }
  0x86   :  { %556 = vmatprep.subr.mxu0 %v512_v26  ;;  %416 = vmatprep.mubr.f32.mxu0 %v2347_v4 }
  0x87   :  { %454 = vmatpush1.msra.mxu1 %v2400_v5  ;;  %487 = vmatprep.mubr.f32.mxu1 %v2347_v4 }
  0x88   :  { %v503_v28 = vpop.permute.xlu0 %502  ;;  %2284 = vmatmul.mubr.msk.f32.vlgmr.msra.gmra.mxu0 %vm61_vm1, %v24_v23  ;;  %v505_v29 = vpop.permute.xlu1 %504 }
  0x89   :  { %v513_v30 = vsel %vm510_vm2, %v501_v24, %v503_v28  ;;  %557 = vmatpush1.msra.mxu0 %v511_v27  ;;  %v514_v31 = vsel %vm510_vm2, %v503_v28, %v505_v29  ;;  %2285 = vmatmul.mubr.msk.f32.vlgmr.msra.gmra.mxu1 %vm61_vm1, %v24_v23 }
  0x8a   :  { %627 = vmatprep.subr.mxu1 %v514_v31  ;;  %590 = vmatprep.mubr.f32.mxu0 %v2347_v4 }
  0x8b   :  { %628 = vmatpush1.msra.mxu1 %v513_v30  ;;  %661 = vmatprep.mubr.f32.mxu1 %v2347_v4 }
  0x8c   :  { %v507_v33 = vpop.permute.xlu0 %506  ;;  %v509_v34 = vpop.permute.xlu1 %508  ;;  %2287 = vmatmul.mubr.msk.f32.vlgmr.msra.gmra.mxu0 %vm61_vm1, %v2286_v32 }
  0x8d   :  { %v515_v35 = vsel %vm510_vm2, %v505_v29, %v507_v33  ;;  %v516_v36 = vsel %vm510_vm2, %v507_v33, %v509_v34  ;;  %732 = vmatprep.mubr.f32.mxu0 %v2347_v4  ;;  %2288 = vmatmul.mubr.msk.f32.vlgmr.msra.gmra.mxu1 %vm61_vm1, %v2286_v32 }
  0x8e   :  { %698 = vmatprep.subr.mxu0 %v516_v36  ;;  %841 = vmatprep.mubr.f32.mxu1 %v2347_v4 }
  0x8f   :  { %699 = vmatpush1.msra.mxu0 %v515_v35 }
  0x90   :  { %v750_v37 = vpop.permute.xlu0 %749  ;;  %v752_v38 = vpop.permute.xlu1 %751  ;;  %2289 = vmatmul.mubr.msk.f32.vlgmr.msra.gmra.mxu0 %vm61_vm1, %v2286_v32 }
  0x91   :  { %v763_v39 = vsel %vm761_vm3, %v750_v37, %v752_v38  ;;  %912 = vmatprep.mubr.f32.mxu0 %v2347_v4 }
  0x92   :  { %807 = vmatprep.subr.mxu1 %v763_v39 }
  0x94   :  { %v754_v40 = vpop.permute.xlu0 %753  ;;  %v756_v41 = vpop.permute.xlu1 %755 }
  0x95   :  { %v764_v42 = vsel %vm761_vm3, %v752_v38, %v754_v40  ;;  %v765_v43 = vsel %vm761_vm3, %v754_v40, %v756_v41 }
  0x96   :  { %878 = vmatprep.subr.mxu0 %v765_v43 }
  0x97   :  { %879 = vmatpush1.msra.mxu0 %v764_v42 }
  0x98   :  { %v748_v45 = vpop.permute.xlu0 %747  ;;  %v758_v46 = vpop.permute.xlu1 %757  ;;  %2292 = vmatmul.mubr.msk.f32.vlgmr.msra.gmra.mxu0 %vm61_vm1, %v2290_v44 }
  0x99   :  { %v762_v47 = vsel %vm761_vm3, %v748_v45, %v750_v37  ;;  %1092 = vmatprep.mubr.f32.mxu0 %v2347_v4  ;;  %v766_v51 = vsel %vm761_vm3, %v756_v41, %v758_v46  ;;  %v2306_v37 = vld [vmem:[%s2591_s1 + $0x38] sm:$0xff] }
  0x9a   :  { %808 = vmatpush1.msra.mxu1 %v762_v47 }
  0x9b   :  { %2291 = vmatmul.mubr.msk.f32.vlgmr.msra.gmra.mxu1 %vm61_vm1, %v2290_v44 }
  0x9c   :  { %v760_v48 = vpop.permute.xlu0 %759  ;;  %v1001_v49 = vpop.permute.xlu1 %1000  ;;  %983 = vmatprep.mubr.f32.mxu1 %v2347_v4 }
  0x9d   :  { %v767_v50 = vsel %vm761_vm3, %v758_v46, %v760_v48 }
  0x9e   :  { %949 = vmatprep.subr.mxu1 %v767_v50 }
  0x9f   :  { %950 = vmatpush1.msra.mxu1 %v766_v51 }
  0xa0   :  { %v1003_v52 = vpop.permute.xlu0 %1002  ;;  %v999_v53 = vpop.permute.xlu1 %998  ;;  %2293 = vmatmul.mubr.msk.f32.vlgmr.msra.gmra.mxu1 %vm61_vm1, %v2290_v44 }
  0xa1   :  { %v1013_v54 = vsel %vm1012_vm4, %v999_v53, %v1001_v49  ;;  %v1014_v55 = vsel %vm1012_vm4, %v1001_v49, %v1003_v52  ;;  %1163 = vmatprep.mubr.f32.mxu1 %v2347_v4  ;;  %v2310_v49 = vld [vmem:[%s2591_s1 + $0x40] sm:$0xff]  ;;  %s2355_s1 = smov [#allocation2]  }
  0xa2   :  { %1058 = vmatprep.subr.mxu0 %v1014_v55  ;;  %s2269_s20 = sshll.u32 %s2355_s1, 4  ;;  %s2270_s20 = int_to_ptr.vmem [resolvable:$true] %s2269_s20 }
  0xa3   :  { %1059 = vmatpush1.msra.mxu0 %v1013_v54  ;;  %s2324_s21 = scalar_lea.vmem %s2270_s20, 768  ;;  %p2329_p1 = scmp.lt.s32.totalorder %s2270_s20, %s2270_s20 }
  0xa4   :  { %v1005_v57 = vpop.permute.xlu0 %1004  ;;  %v1007_v58 = vpop.permute.xlu1 %1006  ;;  %2295 = vmatmul.mubr.msk.f32.vlgmr.msra.gmra.mxu0 %vm61_vm1, %v2294_v56  ;;  %p2325_p0 = scmp.ne.s32.totalorder %s2270_s20, %s2324_s21  ;;  %p2330_p2 = scmp.lt.s32.totalorder %s2324_s21, %s2324_s21 }
  0xa5   :  { %v1015_v59 = vsel %vm1012_vm4, %v1003_v52, %v1005_v57  ;;  %v1016_v60 = vsel %vm1012_vm4, %v1005_v57, %v1007_v58  ;;  %1234 = vmatprep.mubr.f32.mxu0 %v2347_v4 }
  0xa6   :  { %1129 = vmatprep.subr.mxu1 %v1016_v60  ;;  %p2331_p3 = por %p2330_p2, %p2329_p1 }
  0xa7   :  { %1130 = vmatpush1.msra.mxu1 %v1015_v59 }
  0xa8   :  { %v1009_v61 = vpop.permute.xlu0 %1008  ;;  %v1011_v62 = vpop.permute.xlu1 %1010  ;;  %2296 = vmatmul.mubr.msk.f32.vlgmr.msra.gmra.mxu1 %vm61_vm1, %v2294_v56  ;;  %p2332_p4 = pnand %p2331_p3, %p2325_p0 }
  0xa9   :  { %v1017_v63 = vsel %vm1012_vm4, %v1007_v58, %v1009_v61  ;;  %v1018_v0 = vsel %vm1012_vm4, %v1009_v61, %v1011_v62  ;;  %1343 = vmatprep.mubr.f32.mxu1 %v2347_v4 }
  0xaa   :  { %1200 = vmatprep.subr.mxu0 %v1018_v0 }
  0xab   :  { %1201 = vmatpush1.msra.mxu0 %v1017_v63 }
  0xac   :  { %v1252_v1 = vpop.permute.xlu0 %1251  ;;  %v1254_v2 = vpop.permute.xlu1 %1253  ;;  %2297 = vmatmul.mubr.msk.f32.vlgmr.msra.gmra.mxu0 %vm61_vm1, %v2294_v56 }
  0xad   :  { %v1265_v3 = vsel %vm1263_vm5, %v1252_v1, %v1254_v2  ;;  %1414 = vmatprep.mubr.f32.mxu0 %v2347_v4 }
  0xae   :  { %1309 = vmatprep.subr.mxu1 %v1265_v3 }
  0xb0   :  { %v1256_v5 = vpop.permute.xlu0 %1255  ;;  %v1258_v6 = vpop.permute.xlu1 %1257 }
  0xb1   :  { %v1266_v7 = vsel %vm1263_vm5, %v1254_v2, %v1256_v5  ;;  %v1267_v8 = vsel %vm1263_vm5, %v1256_v5, %v1258_v6 }
  0xb2   :  { %1380 = vmatprep.subr.mxu0 %v1267_v8 }
  0xb3   :  { %1381 = vmatpush1.msra.mxu0 %v1266_v7 }
  0xb4   :  { %v1250_v10 = vpop.permute.xlu0 %1249  ;;  %v1260_v11 = vpop.permute.xlu1 %1259  ;;  %2300 = vmatmul.mubr.msk.f32.vlgmr.msra.gmra.mxu0 %vm61_vm1, %v2298_v9 }
  0xb5   :  { %v1264_v12 = vsel %vm1263_vm5, %v1250_v10, %v1252_v1  ;;  %1594 = vmatprep.mubr.f32.mxu0 %v2347_v4  ;;  %v1268_v16 = vsel %vm1263_vm5, %v1258_v6, %v1260_v11 }
  0xb6   :  { %1310 = vmatpush1.msra.mxu1 %v1264_v12 }
  0xb7   :  { %2299 = vmatmul.mubr.msk.f32.vlgmr.msra.gmra.mxu1 %vm61_vm1, %v2298_v9 }
  0xb8   :  { %v1262_v13 = vpop.permute.xlu0 %1261  ;;  %v1503_v14 = vpop.permute.xlu1 %1502  ;;  %1485 = vmatprep.mubr.f32.mxu1 %v2347_v4 }
  0xb9   :  { %v1269_v15 = vsel %vm1263_vm5, %v1260_v11, %v1262_v13 }
  0xba   :  { %1451 = vmatprep.subr.mxu1 %v1269_v15 }
  0xbb   :  { %1452 = vmatpush1.msra.mxu1 %v1268_v16 }
  0xbc   :  { %v1505_v17 = vpop.permute.xlu0 %1504  ;;  %v1501_v18 = vpop.permute.xlu1 %1500  ;;  %2301 = vmatmul.mubr.msk.f32.vlgmr.msra.gmra.mxu1 %vm61_vm1, %v2298_v9 }
  0xbd   :  { %v1515_v19 = vsel %vm1514_vm6, %v1501_v18, %v1503_v14  ;;  %v1516_v20 = vsel %vm1514_vm6, %v1503_v14, %v1505_v17  ;;  %1665 = vmatprep.mubr.f32.mxu1 %v2347_v4 }
  0xbe   :  { %1560 = vmatprep.subr.mxu0 %v1516_v20 }
  0xbf   :  { %1561 = vmatpush1.msra.mxu0 %v1515_v19 }
  0xc0   :  { %v1507_v22 = vpop.permute.xlu0 %1506  ;;  %2303 = vmatmul.mubr.msk.f32.vlgmr.msra.gmra.mxu0 %vm61_vm1, %v2302_v21  ;;  %v1509_v23 = vpop.permute.xlu1 %1508 }
  0xc1   :  { %v1517_v24 = vsel %vm1514_vm6, %v1505_v17, %v1507_v22  ;;  %v1518_v25 = vsel %vm1514_vm6, %v1507_v22, %v1509_v23  ;;  %1736 = vmatprep.mubr.f32.mxu0 %v2347_v4 }
  0xc2   :  { %1631 = vmatprep.subr.mxu1 %v1518_v25 }
  0xc3   :  { %1632 = vmatpush1.msra.mxu1 %v1517_v24 }
  0xc4   :  { %v1511_v26 = vpop.permute.xlu0 %1510  ;;  %2304 = vmatmul.mubr.msk.f32.vlgmr.msra.gmra.mxu1 %vm61_vm1, %v2302_v21  ;;  %v1513_v27 = vpop.permute.xlu1 %1512 }
  0xc5   :  { %v1519_v28 = vsel %vm1514_vm6, %v1509_v23, %v1511_v26  ;;  %v1520_v29 = vsel %vm1514_vm6, %v1511_v26, %v1513_v27  ;;  %1845 = vmatprep.mubr.f32.mxu1 %v2347_v4 }
  0xc6   :  { %1702 = vmatprep.subr.mxu0 %v1520_v29 }
  0xc7   :  { %1703 = vmatpush1.msra.mxu0 %v1519_v28 }
  0xc8   :  { %v1754_v30 = vpop.permute.xlu0 %1753  ;;  %2305 = vmatmul.mubr.msk.f32.vlgmr.msra.gmra.mxu0 %vm61_vm1, %v2302_v21  ;;  %v1756_v31 = vpop.permute.xlu1 %1755 }
  0xc9   :  { %v1767_v32 = vsel %vm1765_vm7, %v1754_v30, %v1756_v31  ;;  %1916 = vmatprep.mubr.f32.mxu0 %v2347_v4 }
  0xca   :  { %1811 = vmatprep.subr.mxu1 %v1767_v32 }
  0xcc   :  { %v1758_v33 = vpop.permute.xlu0 %1757  ;;  %v1760_v34 = vpop.permute.xlu1 %1759 }
  0xcd   :  { %v1768_v35 = vsel %vm1765_vm7, %v1756_v31, %v1758_v33  ;;  %v1769_v36 = vsel %vm1765_vm7, %v1758_v33, %v1760_v34 }
  0xce   :  { %1882 = vmatprep.subr.mxu0 %v1769_v36 }
  0xcf   :  { %1883 = vmatpush1.msra.mxu0 %v1768_v35 }
  0xd0   :  { %v1752_v38 = vpop.permute.xlu0 %1751  ;;  %2308 = vmatmul.mubr.msk.f32.vlgmr.msra.gmra.mxu0 %vm61_vm1, %v2306_v37  ;;  %v1762_v39 = vpop.permute.xlu1 %1761 }
  0xd1   :  { %v1766_v40 = vsel %vm1765_vm7, %v1752_v38, %v1754_v30  ;;  %2096 = vmatprep.mubr.f32.mxu0 %v2347_v4  ;;  %v1770_v44 = vsel %vm1765_vm7, %v1760_v34, %v1762_v39 }
  0xd2   :  { %1812 = vmatpush1.msra.mxu1 %v1766_v40 }
  0xd3   :  { %2307 = vmatmul.mubr.msk.f32.vlgmr.msra.gmra.mxu1 %vm61_vm1, %v2306_v37 }
  0xd4   :  { %v1764_v41 = vpop.permute.xlu0 %1763  ;;  %v2005_v42 = vpop.permute.xlu1 %2004  ;;  %1987 = vmatprep.mubr.f32.mxu1 %v2347_v4 }
  0xd5   :  { %v1771_v43 = vsel %vm1765_vm7, %v1762_v39, %v1764_v41 }
  0xd6   :  { %1953 = vmatprep.subr.mxu1 %v1771_v43 }
  0xd7   :  { %1954 = vmatpush1.msra.mxu1 %v1770_v44 }
  0xd8   :  { %v2007_v45 = vpop.permute.xlu0 %2006  ;;  %2309 = vmatmul.mubr.msk.f32.vlgmr.msra.gmra.mxu1 %vm61_vm1, %v2306_v37  ;;  %v2003_v46 = vpop.permute.xlu1 %2002 }
  0xd9   :  { %v2017_v47 = vsel %vm2016_vm8, %v2003_v46, %v2005_v42  ;;  %v2018_v48 = vsel %vm2016_vm8, %v2005_v42, %v2007_v45  ;;  %2167 = vmatprep.mubr.f32.mxu1 %v2347_v4 }
  0xda   :  { %2062 = vmatprep.subr.mxu0 %v2018_v48 }
  0xdb   :  { %2063 = vmatpush1.msra.mxu0 %v2017_v47 }
  0xdc   :  { %v2009_v50 = vpop.permute.xlu0 %2008  ;;  %2311 = vmatmul.mubr.msk.f32.vlgmr.msra.gmra.mxu0 %vm61_vm1, %v2310_v49  ;;  %v2011_v51 = vpop.permute.xlu1 %2010 }
  0xdd   :  { %v2019_v52 = vsel %vm2016_vm8, %v2007_v45, %v2009_v50  ;;  %v2020_v53 = vsel %vm2016_vm8, %v2009_v50, %v2011_v51  ;;  %2238 = vmatprep.mubr.f32.mxu0 %v2347_v4 }
  0xde   :  { %2133 = vmatprep.subr.mxu1 %v2020_v53 }
  0xdf   :  { %2134 = vmatpush1.msra.mxu1 %v2019_v52 }
  0xe0   :  { %v2013_v54 = vpop.permute.xlu0 %2012  ;;  %2312 = vmatmul.mubr.msk.f32.vlgmr.msra.gmra.mxu1 %vm61_vm1, %v2310_v49  ;;  %v2015_v55 = vpop.permute.xlu1 %2014 }
  0xe1   :  { %v2021_v56 = vsel %vm2016_vm8, %v2011_v51, %v2013_v54  ;;  %v2022_v57 = vsel %vm2016_vm8, %v2013_v54, %v2015_v55 }
  0xe2   :  { %2204 = vmatprep.subr.mxu0 %v2022_v57 }
  0xe3   :  { %2205 = vmatpush1.msra.mxu0 %v2021_v56 }
  0xe4   :  { %2313 = vmatmul.mubr.msk.f32.vlgmr.msra.gmra.mxu0 %vm61_vm1, %v2310_v49 }
 0x13c   :  { %v131_v58 = vpop.f32.mrf.mxu0 }
 0x13e   :  { %v133_v60 = vpop.f32.mrf.mxu0 }
 0x140   :  { %v202_v59 = vpop.f32.mrf.mxu1 }
 0x142   :  { %v204_v61 = vpop.f32.mrf.mxu1 }
 0x144   :  { %v273_v62 = vpop.f32.mrf.mxu0 }
 0x145   :  { %v347_v4 = vpop.f32.mrf.mxu1 }
 0x146   :  { %v275_v63 = vpop.f32.mrf.mxu0  ;;  %v348_v27 = vadd.f32 %v347_v4, %v131_v58 }
 0x147   :  { %v349_v0 = vpop.f32.mrf.mxu1 }
 0x148   :  { %v418_v1 = vpop.f32.mrf.mxu0  ;;  %v350_v30 = vadd.f32 %v349_v0, %v133_v60 }
 0x149   :  { %v489_v2 = vpop.f32.mrf.mxu1  ;;  %v419_v32 = vadd.f32 %v418_v1, %v202_v59 }
 0x14a   :  { %v420_v3 = vpop.f32.mrf.mxu0  ;;  %v490_v38 = vadd.f32 %v489_v2, %v273_v62 }
 0x14b   :  { %v491_v5 = vpop.f32.mrf.mxu1  ;;  %v421_v35 = vadd.f32 %v420_v3, %v204_v61 }
 0x14c   :  { %v592_v6 = vpop.f32.mrf.mxu0  ;;  %v492_v46 = vadd.f32 %v491_v5, %v275_v63 }
 0x14d   :  { %v663_v7 = vpop.f32.mrf.mxu1  ;;  %v739_v33 = vadd.f32 %v592_v6, %v348_v27 }
 0x14e   :  { %v594_v8 = vpop.f32.mrf.mxu0  ;;  %v741_v40 = vadd.f32 %v663_v7, %v419_v32 }
 0x14f   :  { %v665_v9 = vpop.f32.mrf.mxu1  ;;  %v740_v36 = vadd.f32 %v594_v8, %v350_v30 }
 0x150   :  { %v734_v10 = vpop.f32.mrf.mxu0  ;;  %v742_v43 = vadd.f32 %v665_v9, %v421_v35 }
 0x151   :  { %v743_v47 = vadd.f32 %v734_v10, %v490_v38 }
 0x152   :  { %v736_v12 = vpop.f32.mrf.mxu0 }
 0x153   :  { %v744_v54 = vadd.f32 %v736_v12, %v492_v46 }
 0x158   :  { %v914_v14 = vpop.f32.mrf.mxu0 }
 0x159   :  { %v992_v48 = vadd.f32 %v914_v14, %v741_v40 }
 0x15a   :  { %v916_v16 = vpop.f32.mrf.mxu0 }
 0x15b   :  { %v843_v11 = vpop.f32.mrf.mxu1  ;;  %v993_v52 = vadd.f32 %v916_v16, %v742_v43 }
 0x15c   :  { %v990_v41 = vadd.f32 %v843_v11, %v739_v33 }
 0x15d   :  { %v845_v13 = vpop.f32.mrf.mxu1 }
 0x15e   :  { %v991_v44 = vadd.f32 %v845_v13, %v740_v36 }
 0x160   :  { %v985_v15 = vpop.f32.mrf.mxu1 }
 0x161   :  { %v994_v55 = vadd.f32 %v985_v15, %v743_v47 }
 0x162   :  { %v987_v17 = vpop.f32.mrf.mxu1 }
 0x163   :  { %v995_v4 = vadd.f32 %v987_v17, %v744_v54 }
 0x164   :  { %v1094_v18 = vpop.f32.mrf.mxu0 }
 0x165   :  { %v1241_v49 = vadd.f32 %v1094_v18, %v990_v41 }
 0x166   :  { %v1096_v20 = vpop.f32.mrf.mxu0 }
 0x167   :  { %v1242_v53 = vadd.f32 %v1096_v20, %v991_v44 }
 0x168   :  { %v1165_v19 = vpop.f32.mrf.mxu1 }
 0x169   :  { %v1243_v58 = vadd.f32 %v1165_v19, %v992_v48 }
 0x16a   :  { %v1167_v21 = vpop.f32.mrf.mxu1 }
 0x16b   :  { %v1244_v60 = vadd.f32 %v1167_v21, %v993_v52 }
 0x16c   :  { %v1236_v22 = vpop.f32.mrf.mxu0 }
 0x16d   :  { %v1245_v0 = vadd.f32 %v1236_v22, %v994_v55 }
 0x16e   :  { %v1238_v24 = vpop.f32.mrf.mxu0 }
 0x16f   :  { %v1246_v11 = vadd.f32 %v1238_v24, %v995_v4 }
 0x174   :  { %v1416_v26 = vpop.f32.mrf.mxu0 }
 0x175   :  { %v1494_v2 = vadd.f32 %v1416_v26, %v1243_v58 }
 0x176   :  { %v1418_v29 = vpop.f32.mrf.mxu0 }
 0x177   :  { %v1345_v23 = vpop.f32.mrf.mxu1  ;;  %v1495_v7 = vadd.f32 %v1418_v29, %v1244_v60 }
 0x178   :  { %v1492_v59 = vadd.f32 %v1345_v23, %v1241_v49 }
 0x179   :  { %v1347_v25 = vpop.f32.mrf.mxu1 }
 0x17a   :  { %v1493_v61 = vadd.f32 %v1347_v25, %v1242_v53 }
 0x17c   :  { %v1487_v28 = vpop.f32.mrf.mxu1 }
 0x17d   :  { %v1496_v12 = vadd.f32 %v1487_v28, %v1245_v0 }
 0x17e   :  { %v1489_v34 = vpop.f32.mrf.mxu1 }
 0x17f   :  { %v1497_v17 = vadd.f32 %v1489_v34, %v1246_v11 }
 0x180   :  { %v1596_v31 = vpop.f32.mrf.mxu0 }
 0x181   :  { %v1743_v62 = vadd.f32 %v1596_v31, %v1492_v59 }
 0x182   :  { %v1598_v39 = vpop.f32.mrf.mxu0 }
 0x183   :  { %v1744_v3 = vadd.f32 %v1598_v39, %v1493_v61 }
 0x184   :  { %v1667_v37 = vpop.f32.mrf.mxu1 }
 0x185   :  { %v1745_v8 = vadd.f32 %v1667_v37, %v1494_v2 }
 0x186   :  { %v1669_v45 = vpop.f32.mrf.mxu1 }
 0x187   :  { %v1746_v15 = vadd.f32 %v1669_v45, %v1495_v7 }
 0x188   :  { %v1738_v42 = vpop.f32.mrf.mxu0 }
 0x189   :  { %v1747_v21 = vadd.f32 %v1738_v42, %v1496_v12 }
 0x18a   :  { %v1740_v51 = vpop.f32.mrf.mxu0 }
 0x18b   :  { %v1748_v27 = vadd.f32 %v1740_v51, %v1497_v17 }
 0x190   :  { %v1918_v56 = vpop.f32.mrf.mxu0 }
 0x191   :  { %v1996_v16 = vadd.f32 %v1918_v56, %v1745_v8 }
 0x192   :  { %v1920_v1 = vpop.f32.mrf.mxu0 }
 0x193   :  { %v1847_v50 = vpop.f32.mrf.mxu1  ;;  %v1997_v22 = vadd.f32 %v1920_v1, %v1746_v15 }
 0x194   :  { %v1994_v5 = vadd.f32 %v1847_v50, %v1743_v62 }
 0x195   :  { %v1849_v57 = vpop.f32.mrf.mxu1 }
 0x196   :  { %v1995_v9 = vadd.f32 %v1849_v57, %v1744_v3 }
 0x198   :  { %v1989_v63 = vpop.f32.mrf.mxu1 }
 0x199   :  { %v1998_v29 = vadd.f32 %v1989_v63, %v1747_v21 }
 0x19a   :  { %v1991_v13 = vpop.f32.mrf.mxu1 }
 0x19b   :  { %v1999_v31 = vadd.f32 %v1991_v13, %v1748_v27 }
 0x19c   :  { %v2098_v6 = vpop.f32.mrf.mxu0 }
 0x19d   :  { %v2245_v10 = vadd.f32 %v2098_v6, %v1994_v5 }
 0x19e   :  { %v2100_v14 = vpop.f32.mrf.mxu0 }
 0x19f   :  { %v2251_v18 = vmax.f32 %v2245_v10, 0.0  ;;  %v2246_v19 = vadd.f32 %v2100_v14, %v1995_v9 }
 0x1a0   :  { %v2169_v20 = vpop.f32.mrf.mxu1 }
 0x1a1   :  { %2257 = vst [vmem:[#allocation2] sm:$0xff] %v2251_v18  ;;  %v2252_v23 = vmax.f32 %v2246_v19, 0.0  ;;  %v2247_v25 = vadd.f32 %v2169_v20, %v1996_v16 }
 0x1a2   :  { %v2171_v26 = vpop.f32.mrf.mxu1 }
 0x1a3   :  { %2258 = vst [vmem:[#allocation2 + $0x8] sm:$0xff] %v2252_v23  ;;  %v2253_v30 = vmax.f32 %v2247_v25, 0.0  ;;  %v2248_v24 = vadd.f32 %v2171_v26, %v1997_v22 }
 0x1a4   :  { %v2240_v28 = vpop.f32.mrf.mxu0 }
 0x1a5   :  { %2259 = vst [vmem:[#allocation2 + $0x10] sm:$0xff] %v2253_v30  ;;  %v2254_v32 = vmax.f32 %v2248_v24, 0.0  ;;  %v2249_v33 = vadd.f32 %v2240_v28, %v1998_v29 }
 0x1a6   :  { %v2242_v35 = vpop.f32.mrf.mxu0 }
 0x1a7   :  { %2260 = vst [vmem:[#allocation2 + $0x18] sm:$0xff] %v2254_v32  ;;  %v2255_v34 = vmax.f32 %v2249_v33, 0.0  ;;  %v2250_v36 = vadd.f32 %v2242_v35, %v1999_v31 }
 0x1a9   :  { %2261 = vst [vmem:[#allocation2 + $0x20] sm:$0xff] %v2255_v34  ;;  %v2256_v37 = vmax.f32 %v2250_v36, 0.0 }
 0x1ab   :  { %2262 = vst [vmem:[#allocation2 + $0x28] sm:$0xff] %v2256_v37 }
 0x1ac   :  { %2335 = shalt.err (!%p2332_p4)
}
 0x1ad   :  { %2272 = dma.vmem_to_hbm [thread:$0]  %s2270_s20, 768, %s2592_s2, [#allocation3]  }
 0x1ae   :  { %2344 = dma.done.wait [#allocation3], 768  }
 0x1af   :  { %2345 = vsyncadd [#allocation3], 4294966528 }
 0x1b0   :  { %2276 = vsyncpa [#allocation3], 1 }

</bundles_post_ra>
